<compile_context>
chip_gen: v7x
topology: tpu7x:2x2x1
jax: 0.10.0
libtpu: 0.0.40
codegen_flags: <defaults>
</compile_context>

<pallas_src>
import jax
import jax.numpy as jnp
from jax import lax
from jax.experimental import pallas as pl
from jax.experimental.pallas import tpu as pltpu

_LANES = 128
_TARGET_BLOCK_BYTES = 4 << 20   # ~4 MiB per input block (per perf review)


def _round_up(x, m):
    return ((x + m - 1) // m) * m


def _num_core_splits():
    """2 on v7x (2 TensorCores/chip), 1 otherwise (always correct fallback)."""
    try:
        kind = jax.devices()[0].device_kind.lower()
    except Exception:
        return 1
    return 2 if ("v7" in kind or "7x" in kind) else 1


def _make_loss_kernel(rows, block_rows, blocks_per_split):
    def loss_kernel(pred_ref, true_ref, out_ref):
        c = pl.program_id(0)   # core-split axis ("parallel", v7x only)
        i = pl.program_id(1)   # reduction axis ("arbitrary")

        @pl.when(i == 0)
        def _():
            out_ref[...] = jnp.zeros_like(out_ref)

        p = pred_ref[...].astype(jnp.float32)
        t = true_ref[...].astype(jnp.float32)

        d = p - t            # y_pred - y_true
        sq = d * d           # (y_pred - y_true) ** 2
        nd = t - p           # y_true - y_pred

        # torch.where(p > t, sq,
        #   torch.where(nd < 0.02, 2*sq,
        #     torch.where(nd > 0.1, 300*nd*sq, 160*nd*sq)))
        # factored as loss = w * sq (saves two VPU multiplies per vreg).
        coef = jnp.where(nd > 0.1, 300.0, 160.0)
        w = jnp.where(p > t, 1.0, jnp.where(nd < 0.02, 2.0, coef * nd))
        contrib = w * sq

        # Fold the block into the (8, 128) accumulator tile.  The tail mask is
        # hoisted off the hot path: full interior blocks take the unmasked
        # branch; only the ragged last block (and any clamped duplicate block
        # from the 2-way split) pays for iota/compare/select.
        ublk = c * blocks_per_split + i
        rem = rows - ublk * block_rows     # valid rows remaining in this block

        @pl.when(rem >= block_rows)
        def _():
            out_ref[...] += contrib.reshape(-1, 8, _LANES).sum(axis=0)

        @pl.when(rem < block_rows)
        def _():
            row_ids = lax.broadcasted_iota(jnp.int32, (block_rows, _LANES), 0)
            # Select (not multiply-by-mask) so NaN/Inf from padding past the
            # array edge cannot propagate into the accumulator.
            masked = jnp.where(row_ids < rem, contrib, 0.0)
            out_ref[...] += masked.reshape(-1, 8, _LANES).sum(axis=0)

    return loss_kernel


def _elementwise_loss_f32(p, t):
    """Plain-JAX elementwise loss (used for the <=127-element ragged tail)."""
    p = p.astype(jnp.float32)
    t = t.astype(jnp.float32)
    d = p - t
    nd = t - p
    sq = d * d
    coef = jnp.where(nd > 0.1, 300.0, 160.0)
    w = jnp.where(p > t, 1.0, jnp.where(nd < 0.02, 2.0, coef * nd))
    return w * sq


def asymmetric_loss(y_pred, y_true):
    """Pallas TPU equivalent of AsymmetricLoss()(y_pred, y_true)."""
    assert y_pred.shape == y_true.shape
    total = int(y_pred.size)
    if total == 0:
        return jnp.float32(jnp.nan)  # matches mean() of an empty tensor

    # Keep the original dtype; cast to f32 inside the kernel (halves HBM
    # traffic for 16-bit inputs).
    p_flat = jnp.ravel(y_pred)
    t_flat = jnp.ravel(y_true)

    rows = total // _LANES
    tail = total - rows * _LANES
    loss_sum = jnp.float32(0.0)

    if rows > 0:
        if tail:
            p_main = p_flat[: rows * _LANES]
            t_main = t_flat[: rows * _LANES]
        else:
            p_main, t_main = p_flat, t_flat
        p2d = p_main.reshape(rows, _LANES)
        t2d = t_main.reshape(rows, _LANES)

        # Sublane multiple for the block's second-to-last dim
        # (f32: 8, 16-bit: 16, 8-bit: 32).
        sub_tbl = {4: 8, 2: 16, 1: 32}
        p_item = jnp.dtype(p2d.dtype).itemsize
        t_item = jnp.dtype(t2d.dtype).itemsize
        sub = max(sub_tbl.get(p_item, 8), sub_tbl.get(t_item, 8))

        # ~4 MiB per input block, rounded down to a sublane multiple.
        max_block_rows = max(_TARGET_BLOCK_BYTES // (_LANES * max(p_item, t_item)), sub)
        max_block_rows = (max_block_rows // sub) * sub
        block_rows = min(max_block_rows, _round_up(rows, sub))

        n_blocks = pl.cdiv(rows, block_rows)
        splits = _num_core_splits() if n_blocks >= 2 else 1
        blocks_per_split = pl.cdiv(n_blocks, splits)

        # VMEM budget: 2 inputs x 2 pipeline buffers x block, plus the tiny
        # (8,128) accumulators and headroom.  Floor at 32 MiB (>= any default
        # scoped limit), cap at 48 MiB (safe on v7x's 64 MiB physical VMEM).
        in_block_bytes = block_rows * _LANES * (p_item + t_item)
        vmem_limit = int(min(max(2 * in_block_bytes + (8 << 20), 32 << 20), 48 << 20))

        def in_index_map(c, i):
            # Clamp so a fully out-of-range step (odd n_blocks with 2 splits)
            # re-reads the last valid block; its contribution is masked to
            # zero inside the kernel.
            return (jnp.minimum(c * blocks_per_split + i, n_blocks - 1), 0)

        partials = pl.pallas_call(
            _make_loss_kernel(rows, block_rows, blocks_per_split),
            out_shape=jax.ShapeDtypeStruct((splits * 8, _LANES), jnp.float32),
            grid_spec=pltpu.PrefetchScalarGridSpec(
                num_scalar_prefetch=0,
                grid=(splits, blocks_per_split),
                in_specs=[
                    pl.BlockSpec((block_rows, _LANES), in_index_map),
                    pl.BlockSpec((block_rows, _LANES), in_index_map),
                ],
                out_specs=pl.BlockSpec((8, _LANES), lambda c, i: (c, 0)),
            ),
            compiler_params=pltpu.CompilerParams(
                dimension_semantics=("parallel", "arbitrary"),
                vmem_limit_bytes=vmem_limit,
            ),
        )(p2d, t2d)

        loss_sum = loss_sum + jnp.sum(partials)

    if tail:
        # <=127 leftover elements: handle in plain JAX (avoids a full padded
        # copy of both inputs just for the tail).
        p_tail = p_flat[rows * _LANES:]
        t_tail = t_flat[rows * _LANES:]
        loss_sum = loss_sum + jnp.sum(_elementwise_loss_f32(p_tail, t_tail))

    return loss_sum / jnp.float32(total)


def asymmetric_loss_ref(y_pred, y_true):
    """Pure-JAX reference (literal transcription of the torch formula)."""
    p = y_pred.astype(jnp.float32)
    t = y_true.astype(jnp.float32)
    d = p - t
    nd = t - p
    sq = d * d
    loss = jnp.where(
        p > t,
        sq,
        jnp.where(nd < 0.02, 2.0 * sq,
                  jnp.where(nd > 0.1, 300.0 * nd * sq, 160.0 * nd * sq)),
    )
    return jnp.mean(loss)


if __name__ == "__main__":
    key = jax.random.PRNGKey(0)
    k1, k2 = jax.random.split(key)

    # Small shape consistent with an NCHW prediction tensor (lane-aligned).
    shape = (2, 4, 16, 16)
    y_pred = jax.random.uniform(k1, shape, dtype=jnp.float32)
    y_true = jax.random.uniform(k2, shape, dtype=jnp.float32)
    out = jax.block_until_ready(asymmetric_loss(y_pred, y_true))
    ref = asymmetric_loss_ref(y_pred, y_true)
    assert jnp.allclose(out, ref, rtol=1e-5, atol=1e-6), (out, ref)

    # Lane-unaligned shape: exercises the masked last block + JAX tail path.
    k3, k4 = jax.random.split(k2)
    shape2 = (5, 17, 17)   # 1445 elements = 11*128 + 37
    y_pred2 = jax.random.uniform(k3, shape2, dtype=jnp.float32)
    y_true2 = jax.random.uniform(k4, shape2, dtype=jnp.float32)
    out2 = jax.block_until_ready(asymmetric_loss(y_pred2, y_true2))
    ref2 = asymmetric_loss_ref(y_pred2, y_true2)
    assert jnp.allclose(out2, ref2, rtol=1e-5, atol=1e-6), (out2, ref2)

    print("KERNEL_OK")
</pallas_src>

<mosaic_0001>
module attributes {stable_mosaic.version = 11 : i64} {
  func.func @loss_kernel(%arg0: i32, %arg1: i32, %arg2: memref<16x128xf32, #tpu.memory_space<vmem>>, %arg3: memref<16x128xf32, #tpu.memory_space<vmem>>, %arg4: memref<8x128xf32, #tpu.memory_space<vmem>>) attributes {dimension_semantics = [#tpu.dimension_semantics<parallel>, #tpu.dimension_semantics<arbitrary>], iteration_bounds = array<i64: 1, 1>, scalar_prefetch = 0 : i64, scratch_operands = 0 : i64, tpu.core_type = #tpu.core_type<tc>, window_params = [{transform_indices = @transform_0, window_bounds = array<i64: 16, 128>}, {transform_indices = @transform_1, window_bounds = array<i64: 16, 128>}, {transform_indices = @transform_2, window_bounds = array<i64: 8, 128>}]} {
    %c0_i32 = arith.constant 0 : i32
    %0 = arith.cmpi eq, %arg1, %c0_i32 : i32
    %1 = arith.extui %0 : i1 to i32
    %c0_i32_0 = arith.constant 0 : i32
    %2 = arith.cmpi ne, %1, %c0_i32_0 : i32
    scf.if %2 {
      %cst_14 = arith.constant 0.000000e+00 : f32
      %32 = vector.broadcast %cst_14 : f32 to vector<8x128xf32>
      %c0_15 = arith.constant 0 : index
      %c0_16 = arith.constant 0 : index
      %33 = vector.load %arg4[%c0_15, %c0_16] : memref<8x128xf32, #tpu.memory_space<vmem>>, vector<8x128xf32>
      tpu.vector_store %arg4[%c0_15, %c0_16], %32 {strides = array<i32>} : memref<8x128xf32, #tpu.memory_space<vmem>>, vector<8x128xf32>,
    } else {
    }
    %c0 = arith.constant 0 : index
    %c0_1 = arith.constant 0 : index
    %3 = vector.load %arg2[%c0, %c0_1] : memref<16x128xf32, #tpu.memory_space<vmem>>, vector<16x128xf32>
    %c0_2 = arith.constant 0 : index
    %c0_3 = arith.constant 0 : index
    %4 = vector.load %arg3[%c0_2, %c0_3] : memref<16x128xf32, #tpu.memory_space<vmem>>, vector<16x128xf32>
    %5 = arith.subf %3, %4 : vector<16x128xf32>
    %6 = arith.mulf %5, %5 : vector<16x128xf32>
    %7 = arith.subf %4, %3 : vector<16x128xf32>
    %cst = arith.constant 1.000000e-01 : f32
    %8 = vector.broadcast %cst : f32 to vector<16x128xf32>
    %9 = arith.cmpf ogt, %7, %8 : vector<16x128xf32>
    %cst_4 = arith.constant 3.000000e+02 : f32
    %cst_5 = arith.constant 1.600000e+02 : f32
    %10 = vector.broadcast %cst_4 : f32 to vector<16x128xf32>
    %11 = vector.broadcast %cst_5 : f32 to vector<16x128xf32>
    %12 = arith.select %9, %10, %11 : vector<16x128xi1>, vector<16x128xf32>
    %13 = arith.cmpf ogt, %3, %4 : vector<16x128xf32>
    %cst_6 = arith.constant 2.000000e-02 : f32
    %14 = vector.broadcast %cst_6 : f32 to vector<16x128xf32>
    %15 = arith.cmpf olt, %7, %14 : vector<16x128xf32>
    %16 = arith.mulf %12, %7 : vector<16x128xf32>
    %cst_7 = arith.constant 2.000000e+00 : f32
    %17 = vector.broadcast %cst_7 : f32 to vector<16x128xf32>
    %18 = arith.select %15, %17, %16 : vector<16x128xi1>, vector<16x128xf32>
    %cst_8 = arith.constant 1.000000e+00 : f32
    %19 = vector.broadcast %cst_8 : f32 to vector<16x128xf32>
    %20 = arith.select %13, %19, %18 : vector<16x128xi1>, vector<16x128xf32>
    %21 = arith.mulf %20, %6 : vector<16x128xf32>
    %c1_i32 = arith.constant 1 : i32
    %22 = arith.muli %arg0, %c1_i32 : i32
    %23 = arith.addi %22, %arg1 : i32
    %c16_i32 = arith.constant 16 : i32
    %24 = arith.muli %23, %c16_i32 : i32
    %c16_i32_9 = arith.constant 16 : i32
    %25 = arith.subi %c16_i32_9, %24 : i32
    %c16_i32_10 = arith.constant 16 : i32
    %26 = arith.cmpi sge, %25, %c16_i32_10 : i32
    %27 = arith.extui %26 : i1 to i32
    %c0_i32_11 = arith.constant 0 : i32
    %28 = arith.cmpi ne, %27, %c0_i32_11 : i32
    scf.if %28 {
      %c0_14 = arith.constant 0 : index
      %c0_15 = arith.constant 0 : index
      %32 = vector.load %arg4[%c0_14, %c0_15] : memref<8x128xf32, #tpu.memory_space<vmem>>, vector<8x128xf32>
      %33 = vector.shape_cast %21 : vector<16x128xf32> to vector<2x8x128xf32>
      %cst_16 = arith.constant dense<0.000000e+00> : vector<8x128xf32>
      %34 = vector.multi_reduction <add>, %33, %cst_16 [0] : vector<2x8x128xf32> to vector<8x128xf32>
      %35 = arith.addf %32, %34 : vector<8x128xf32>
      %c0_17 = arith.constant 0 : index
      %c0_18 = arith.constant 0 : index
      %36 = vector.load %arg4[%c0_17, %c0_18] : memref<8x128xf32, #tpu.memory_space<vmem>>, vector<8x128xf32>
      tpu.vector_store %arg4[%c0_17, %c0_18], %35 {strides = array<i32>} : memref<8x128xf32, #tpu.memory_space<vmem>>, vector<8x128xf32>,
    } else {
    }
    %c16_i32_12 = arith.constant 16 : i32
    %29 = arith.cmpi slt, %25, %c16_i32_12 : i32
    %30 = arith.extui %29 : i1 to i32
    %c0_i32_13 = arith.constant 0 : i32
    %31 = arith.cmpi ne, %30, %c0_i32_13 : i32
    scf.if %31 {
      %32 = tpu.iota {dimensions = array<i32: 0>} : vector<16x128xi32>
      %33 = vector.broadcast %25 : i32 to vector<16x128xi32>
      %34 = arith.cmpi slt, %32, %33 : vector<16x128xi32>
      %cst_14 = arith.constant 0.000000e+00 : f32
      %35 = vector.broadcast %cst_14 : f32 to vector<16x128xf32>
      %36 = arith.select %34, %21, %35 : vector<16x128xi1>, vector<16x128xf32>
      %c0_15 = arith.constant 0 : index
      %c0_16 = arith.constant 0 : index
      %37 = vector.load %arg4[%c0_15, %c0_16] : memref<8x128xf32, #tpu.memory_space<vmem>>, vector<8x128xf32>
      %38 = vector.shape_cast %36 : vector<16x128xf32> to vector<2x8x128xf32>
      %cst_17 = arith.constant dense<0.000000e+00> : vector<8x128xf32>
      %39 = vector.multi_reduction <add>, %38, %cst_17 [0] : vector<2x8x128xf32> to vector<8x128xf32>
      %40 = arith.addf %37, %39 : vector<8x128xf32>
      %c0_18 = arith.constant 0 : index
      %c0_19 = arith.constant 0 : index
      %41 = vector.load %arg4[%c0_18, %c0_19] : memref<8x128xf32, #tpu.memory_space<vmem>>, vector<8x128xf32>
      tpu.vector_store %arg4[%c0_18, %c0_19], %40 {strides = array<i32>} : memref<8x128xf32, #tpu.memory_space<vmem>>, vector<8x128xf32>,
    } else {
    }
    return
  }
  func.func @transform_0(%arg0: i32, %arg1: i32) -> (i32, i32) {
    %c1_i32 = arith.constant 1 : i32
    %0 = arith.muli %arg0, %c1_i32 : i32
    %1 = arith.addi %0, %arg1 : i32
    %c0_i32 = arith.constant 0 : i32
    %2 = arith.minsi %1, %c0_i32 : i32
    %c0_i32_0 = arith.constant 0 : i32
    %c0_i32_1 = arith.constant 0 : i32
    return %2, %c0_i32_0 : i32, i32
  }
  func.func @transform_1(%arg0: i32, %arg1: i32) -> (i32, i32) {
    %c1_i32 = arith.constant 1 : i32
    %0 = arith.muli %arg0, %c1_i32 : i32
    %1 = arith.addi %0, %arg1 : i32
    %c0_i32 = arith.constant 0 : i32
    %2 = arith.minsi %1, %c0_i32 : i32
    %c0_i32_0 = arith.constant 0 : i32
    %c0_i32_1 = arith.constant 0 : i32
    return %2, %c0_i32_0 : i32, i32
  }
  func.func @transform_2(%arg0: i32, %arg1: i32) -> (i32, i32) {
    %c0_i32 = arith.constant 0 : i32
    %c0_i32_0 = arith.constant 0 : i32
    return %arg0, %c0_i32 : i32, i32
  }
}

</mosaic_0001>

<bundles_post_ra>
// kernel: tpu_custom_call.1
= control target key start
LH: loop header
LB: loop body
LE: loop exit
PB: predicated region body
PF: predicated region fallthrough
CT: control target
= control target key end

     0   :  { %7 = vsyncpa [#allocation3], 0  ;;  %s274_s0 = inlined_call_operand.hbm [shape: f32[16,128], index: 0, kind: input, shape index: {}]   ;;  %s275_s1 = inlined_call_operand.hbm [shape: f32[16,128], index: 1, kind: input, shape index: {}]   ;;  %s276_s2 = inlined_call_operand.hbm [shape: f32[8,128], index: 2, kind: output, shape index: {}]  }
   0x1   :  { %8 = vsyncpa [#allocation6], 0 }
   0x2   :  { %9 = vsyncpa [#allocation4], 0  ;;  %s217_s9 = smov [#allocation2]   ;;  %s145_s13 = scalar_lea.hbm %s274_s0, 256 }
   0x3   :  { %s21_s10 = sshll.u32 %s217_s9, 4  ;;  %p146_p0 = scmp.ne.s32.totalorder %s274_s0, %s145_s13  ;;  %s22_s10 = int_to_ptr.vmem [resolvable:$true] %s21_s10 }
   0x4   :  { %p149_p1 = scmp.lt.u32.totalorder %s145_s13, %s274_s0 }
   0x6   :  { %p151_p2 = pnand %p149_p1, %p146_p0 }
   0x8   :  { %154 = shalt.err (!%p151_p2)
}
   0x9   :  { %s155_s18 = scalar_lea.vmem %s22_s10, 256  ;;  %p160_p4 = scmp.lt.s32.totalorder %s22_s10, %s22_s10 }
   0xa   :  { %p156_p3 = scmp.ne.s32.totalorder %s22_s10, %s155_s18  ;;  %p161_p5 = scmp.lt.s32.totalorder %s155_s18, %s155_s18 }
   0xc   :  { %p162_p6 = por %p161_p5, %p160_p4 }
   0xe   :  { %p163_p7 = pnand %p162_p6, %p156_p3 }
  0x10   :  { %166 = shalt.err (!%p163_p7)
}
  0x11   :  { %s218_s19 = smov 128   ;;  %s219_s20 = smov 8  }
  0x12   :  { %27 = dma.hbm_to_vmem [thread:$0]  %s274_s0, 256, %s22_s10, [#allocation3], %s218_s19, %s218_s19, %s219_s20  }
  0x13   :  { %s220_s23 = smov [#allocation5]   ;;  %s167_s27 = scalar_lea.hbm %s275_s1, 256 }
  0x14   :  { %s39_s24 = sshll.u32 %s220_s23, 4  ;;  %p168_p8 = scmp.ne.s32.totalorder %s275_s1, %s167_s27  ;;  %s40_s24 = int_to_ptr.vmem [resolvable:$true] %s39_s24 }
  0x15   :  { %p171_p9 = scmp.lt.u32.totalorder %s167_s27, %s275_s1 }
  0x17   :  { %p173_p10 = pnand %p171_p9, %p168_p8 }
  0x19   :  { %176 = shalt.err (!%p173_p10)
}
  0x1a   :  { %s177_s4 = scalar_lea.vmem %s40_s24, 256  ;;  %p182_p12 = scmp.lt.s32.totalorder %s40_s24, %s40_s24 }
  0x1b   :  { %p178_p11 = scmp.ne.s32.totalorder %s40_s24, %s177_s4  ;;  %p183_p13 = scmp.lt.s32.totalorder %s177_s4, %s177_s4 }
  0x1d   :  { %p184_p0 = por %p183_p13, %p182_p12 }
  0x1f   :  { %p185_p1 = pnand %p184_p0, %p178_p11 }
  0x21   :  { %188 = shalt.err (!%p185_p1)
}
  0x22   :  { %45 = dma.hbm_to_vmem [thread:$0]  %s275_s1, 256, %s40_s24, [#allocation6], %s218_s19, %s218_s19, %s219_s20  }
  0x23   :  { %211 = dma.done.wait [#allocation3], 256  }
  0x24   :  { %212 = vsyncadd [#allocation3], 4294967040 }
  0x25   :  { %213 = dma.done.wait [#allocation6], 256  }
  0x26   :  { %214 = vsyncadd [#allocation6], 4294967040  ;;  %v65_v0 = vld [vmem:[#allocation2] sm:$0xff]  ;;  %v66_v1 = vld [vmem:[#allocation2 + $0x8] sm:$0xff]  ;;  %v221_v8 = vmov 160.0   ;;  %s222_s1 = smov [#allocation7]  }
  0x27   :  { %v67_v2 = vld [vmem:[#allocation5] sm:$0xff]  ;;  %v68_v3 = vld [vmem:[#allocation5 + $0x8] sm:$0xff]  ;;  %s124_s6 = sshll.u32 %s222_s1, 4  ;;  %s125_s6 = int_to_ptr.vmem [resolvable:$true] %s124_s6 }
  0x28   :  { %v69_v4 = vsub.f32 %v65_v0, %v67_v2  ;;  %v73_v5 = vsub.f32 %v67_v2, %v65_v0  ;;  %v70_v6 = vsub.f32 %v66_v1, %v68_v3  ;;  %v74_v7 = vsub.f32 %v68_v3, %v66_v1  ;;  %s189_s7 = scalar_lea.vmem %s125_s6, 128  ;;  %p194_p3 = scmp.lt.s32.totalorder %s125_s6, %s125_s6 }
  0x29   :  { %vm79_vm2 = vcmp.gt.f32.partialorder %v65_v0, %v67_v2  ;;  %vm80_vm5 = vcmp.gt.f32.partialorder %v66_v1, %v68_v3  ;;  %p190_p2 = scmp.ne.s32.totalorder %s125_s6, %s189_s7  ;;  %p195_p4 = scmp.lt.s32.totalorder %s189_s7, %s189_s7 }
  0x2a   :  { %vm75_vm0 = vcmp.gt.f32.partialorder %v73_v5, 0.1  ;;  %vm76_vm1 = vcmp.gt.f32.partialorder %v74_v7, 0.1  ;;  %vm81_vm3 = vcmp.lt.f32.partialorder %v73_v5, 0.02  ;;  %v71_v10 = vmul.f32 %v69_v4, %v69_v4 }
  0x2b   :  { %v77_v9 = vsel %vm75_vm0, 300.0, %v221_v8  ;;  %v78_v11 = vsel %vm76_vm1, 300.0, %v221_v8  ;;  %vm82_vm4 = vcmp.lt.f32.partialorder %v74_v7, 0.02  ;;  %v72_v13 = vmul.f32 %v70_v6, %v70_v6  ;;  %p196_p5 = por %p195_p4, %p194_p3 }
  0x2c   :  { %v83_v12 = vmul.f32 %v77_v9, %v73_v5  ;;  %v84_v14 = vmul.f32 %v78_v11, %v74_v7 }
  0x2d   :  { %p197_p6 = pnand %p196_p5, %p190_p2 }
  0x2e   :  { %v85_v15 = vsel %vm81_vm3, 2.0, %v83_v12  ;;  %v86_v16 = vsel %vm82_vm4, 2.0, %v84_v14 }
  0x2f   :  { %v87_v17 = vsel %vm79_vm2, 1.0, %v85_v15  ;;  %v88_v18 = vsel %vm80_vm5, 1.0, %v86_v16 }
  0x30   :  { %v89_v19 = vmul.f32 %v87_v17, %v71_v10  ;;  %v90_v20 = vmul.f32 %v88_v18, %v72_v13 }
  0x32   :  { %v99_v21 = vadd.f32 %v90_v20, %v89_v19 }
  0x34   :  { %101 = vst [vmem:[#allocation7] sm:$0xff] %v99_v21 }
  0x35   :  { %200 = shalt.err (!%p197_p6)
}
  0x36   :  { %s201_s10 = scalar_lea.hbm %s276_s2, 128 }
  0x37   :  { %p202_p7 = scmp.ne.s32.totalorder %s276_s2, %s201_s10  ;;  %p205_p8 = scmp.lt.u32.totalorder %s201_s10, %s276_s2 }
  0x39   :  { %p207_p9 = pnand %p205_p8, %p202_p7 }
  0x3b   :  { %210 = shalt.err (!%p207_p9)
}
  0x3c   :  { %127 = dma.vmem_to_hbm [thread:$0]  %s125_s6, 128, %s276_s2, [#allocation4]  }
  0x3d   :  { %215 = dma.done.wait [#allocation4], 128  }
  0x3e   :  { %216 = vsyncadd [#allocation4], 4294967168 }
  0x3f   :  { %131 = vsyncpa [#allocation3], 1 }
  0x40   :  { %132 = vsyncpa [#allocation6], 1 }
  0x41   :  { %133 = vsyncpa [#allocation4], 1 }

</bundles_post_ra>
